<compile_context>
chip_gen: v6e
topology: v6e:2x2x1
jax: 0.10.0
libtpu: 0.0.40
codegen_flags: <defaults>
</compile_context>

<pallas_src>
import jax
import jax.numpy as jnp
from jax.experimental import pallas as pl
from jax.experimental.pallas import tpu as pltpu


BN_EPS = 1e-5  # torch.nn.BatchNorm1d default


def _choose_tile(seq_len: int) -> int:
    """Largest lane tile in {1024,512,256,128} dividing L, else the full axis."""
    for cand in (1024, 512, 256, 128):
        if seq_len >= cand and seq_len % cand == 0:
            return cand
    return seq_len  # small / non-128-multiple sequence lengths: whole axis


def _stats_kernel(x_ref, sum_ref, sq_ref):
    """Phase 0: accumulate per-channel sum and sum-of-squares over (N, L).

    x_ref:   (C, tL)  channels on sublanes, positions on lanes (lane reduce -> XLU)
    sum_ref: (C, 1)   accumulator, resident across the whole grid
    sq_ref:  (C, 1)
    """
    @pl.when(jnp.logical_and(pl.program_id(0) == 0, pl.program_id(1) == 0))
    def _():
        sum_ref[...] = jnp.zeros_like(sum_ref)
        sq_ref[...] = jnp.zeros_like(sq_ref)

    x = x_ref[...].astype(jnp.float32)
    sum_ref[...] += jnp.sum(x, axis=1, keepdims=True)
    sq_ref[...] += jnp.sum(x * x, axis=1, keepdims=True)


def _conv1x1_kernel(x_ref, w_ref, b_ref, o_ref):
    """Phase 1: out = W' @ x + b' for one (batch, position-tile) block.

    x_ref: (C, tL)   w_ref: (O, C) folded weight   b_ref: (O, 1)   o_ref: (O, tL)
    """
    x = x_ref[...].astype(jnp.float32)
    out = jnp.dot(w_ref[...], x, preferred_element_type=jnp.float32)
    o_ref[...] = (out + b_ref[...]).astype(o_ref.dtype)


def net_forward(x_ncl, bn_gamma, bn_beta, conv_w, conv_b, *, use_bn=True):
    """Pallas implementation of poptimizer wave_net inputs.Net.forward.

    x_ncl:    (N, C, L) float32 — NUMERICAL feature tensor (PyTorch NCL layout).
    bn_gamma: (C,) BN weight,  bn_beta: (C,) BN bias.
    conv_w:   (O, C, 1) Conv1d weight, conv_b: (O,) Conv1d bias.
    Returns:  (N, O, L) float32.
    """
    n, c, l = x_ncl.shape
    o = conv_w.shape[0]
    tl = _choose_tile(l)
    nlt = l // tl

    w = conv_w[:, :, 0].astype(jnp.float32)  # (O, C)
    b = conv_b.astype(jnp.float32)           # (O,)

    if use_bn:
        ch_sum, ch_sq = pl.pallas_call(
            _stats_kernel,
            out_shape=(
                jax.ShapeDtypeStruct((c, 1), jnp.float32),
                jax.ShapeDtypeStruct((c, 1), jnp.float32),
            ),
            grid=(n, nlt),
            in_specs=[pl.BlockSpec((None, c, tl), lambda i, t: (i, 0, t))],
            out_specs=(
                pl.BlockSpec((c, 1), lambda i, t: (0, 0)),
                pl.BlockSpec((c, 1), lambda i, t: (0, 0)),
            ),
            compiler_params=pltpu.CompilerParams(
                dimension_semantics=("arbitrary", "arbitrary")
            ),
        )(x_ncl)

        count = jnp.float32(n * l)
        mean = ch_sum[:, 0] / count
        # Biased (training-mode) batch variance via E[x^2] - mean^2, clamped >= 0.
        # TODO(synk): for extreme-magnitude inputs a centered two-pass variance is safer.
        var = jnp.maximum(ch_sq[:, 0] / count - mean * mean, 0.0)
        inv_std = jax.lax.rsqrt(var + BN_EPS)
        scale = bn_gamma.astype(jnp.float32) * inv_std              # (C,)
        w_eff = w * scale[None, :]                                  # (O, C)
        b_eff = b + w @ (bn_beta.astype(jnp.float32) - mean * scale)  # (O,)
    else:
        # use_bn=False: Identity followed by Conv1d(kernel_size=1).
        w_eff, b_eff = w, b

    out = pl.pallas_call(
        _conv1x1_kernel,
        out_shape=jax.ShapeDtypeStruct((n, o, l), jnp.float32),
        grid=(n, nlt),
        in_specs=[
            pl.BlockSpec((None, c, tl), lambda i, t: (i, 0, t)),
            pl.BlockSpec((o, c), lambda i, t: (0, 0)),
            pl.BlockSpec((o, 1), lambda i, t: (0, 0)),
        ],
        out_specs=pl.BlockSpec((None, o, tl), lambda i, t: (i, 0, t)),
        compiler_params=pltpu.CompilerParams(
            dimension_semantics=("parallel", "parallel")
        ),
    )(x_ncl, w_eff, b_eff.reshape(o, 1))

    return out


def _reference(x_ncl, bn_gamma, bn_beta, conv_w, conv_b, *, use_bn=True):
    """Pure-JAX reference mirroring the PyTorch forward (training-mode BN)."""
    x = x_ncl.astype(jnp.float32)
    if use_bn:
        mean = jnp.mean(x, axis=(0, 2), keepdims=True)
        var = jnp.mean((x - mean) ** 2, axis=(0, 2), keepdims=True)
        x = (x - mean) / jnp.sqrt(var + BN_EPS)
        x = x * bn_gamma[None, :, None] + bn_beta[None, :, None]
    w = conv_w[:, :, 0]  # (O, C)
    return jnp.einsum("ncl,oc->nol", x, w) + conv_b[None, :, None]


if __name__ == "__main__":
    key = jax.random.PRNGKey(0)
    k_x, k_g, k_b, k_w, k_cb = jax.random.split(key, 5)

    # Small shapes consistent with the module: batch=2, num_feat_count=4,
    # seq_len=16, out_channels=8.
    N, C, L, O = 2, 4, 16, 8

    x = jax.random.normal(k_x, (N, C, L), dtype=jnp.float32)
    bn_gamma = 1.0 + 0.1 * jax.random.normal(k_g, (C,), dtype=jnp.float32)
    bn_beta = 0.1 * jax.random.normal(k_b, (C,), dtype=jnp.float32)
    conv_w = jax.random.normal(k_w, (O, C, 1), dtype=jnp.float32) / jnp.sqrt(C)
    conv_b = 0.1 * jax.random.normal(k_cb, (O,), dtype=jnp.float32)

    # use_bn=True path
    out_bn = jax.block_until_ready(
        net_forward(x, bn_gamma, bn_beta, conv_w, conv_b, use_bn=True)
    )
    ref_bn = _reference(x, bn_gamma, bn_beta, conv_w, conv_b, use_bn=True)
    assert out_bn.shape == (N, O, L), out_bn.shape
    assert jnp.allclose(out_bn, ref_bn, atol=1e-4, rtol=1e-4), float(
        jnp.max(jnp.abs(out_bn - ref_bn))
    )

    # use_bn=False path (Identity + Conv1d)
    out_id = jax.block_until_ready(
        net_forward(x, bn_gamma, bn_beta, conv_w, conv_b, use_bn=False)
    )
    ref_id = _reference(x, bn_gamma, bn_beta, conv_w, conv_b, use_bn=False)
    assert jnp.allclose(out_id, ref_id, atol=1e-4, rtol=1e-4), float(
        jnp.max(jnp.abs(out_id - ref_id))
    )

    print("KERNEL_OK")
</pallas_src>

<mosaic_0001>
module attributes {stable_mosaic.version = 11 : i64} {
  func.func @_stats_kernel(%arg0: i32, %arg1: i32, %arg2: memref<1x4x16xf32, #tpu.memory_space<vmem>>, %arg3: memref<4x1xf32, #tpu.memory_space<vmem>>, %arg4: memref<4x1xf32, #tpu.memory_space<vmem>>) attributes {dimension_semantics = [#tpu.dimension_semantics<arbitrary>, #tpu.dimension_semantics<arbitrary>], iteration_bounds = array<i64: 2, 1>, scalar_prefetch = 0 : i64, scratch_operands = 0 : i64, tpu.core_type = #tpu.core_type<tc>, window_params = [{transform_indices = @transform_0, window_bounds = array<i64: 1, 4, 16>}, {pipeline_mode = #tpu.pipeline_mode<synchronous>, transform_indices = @transform_1, window_bounds = array<i64: 4, 1>}, {pipeline_mode = #tpu.pipeline_mode<synchronous>, transform_indices = @transform_2, window_bounds = array<i64: 4, 1>}]} {
    %c0_i32 = arith.constant 0 : i32
    %0 = arith.cmpi eq, %arg0, %c0_i32 : i32
    %c0_i32_0 = arith.constant 0 : i32
    %1 = arith.cmpi eq, %arg1, %c0_i32_0 : i32
    %2 = arith.andi %0, %1 : i1
    %3 = arith.extui %2 : i1 to i32
    %c0_i32_1 = arith.constant 0 : i32
    %4 = arith.cmpi ne, %3, %c0_i32_1 : i32
    scf.if %4 {
      %cst_13 = arith.constant 0.000000e+00 : f32
      %18 = vector.broadcast %cst_13 : f32 to vector<4x1xf32>
      %c0_14 = arith.constant 0 : index
      %c0_15 = arith.constant 0 : index
      %19 = vector.load %arg3[%c0_14, %c0_15] : memref<4x1xf32, #tpu.memory_space<vmem>>, vector<4x1xf32>
      tpu.vector_store %arg3[%c0_14, %c0_15], %18 {strides = array<i32>} : memref<4x1xf32, #tpu.memory_space<vmem>>, vector<4x1xf32>,
      %cst_16 = arith.constant 0.000000e+00 : f32
      %20 = vector.broadcast %cst_16 : f32 to vector<4x1xf32>
      %c0_17 = arith.constant 0 : index
      %c0_18 = arith.constant 0 : index
      %21 = vector.load %arg4[%c0_17, %c0_18] : memref<4x1xf32, #tpu.memory_space<vmem>>, vector<4x1xf32>
      tpu.vector_store %arg4[%c0_17, %c0_18], %20 {strides = array<i32>} : memref<4x1xf32, #tpu.memory_space<vmem>>, vector<4x1xf32>,
    } else {
    }
    %c0 = arith.constant 0 : index
    %c0_2 = arith.constant 0 : index
    %c0_3 = arith.constant 0 : index
    %5 = vector.load %arg2[%c0, %c0_2, %c0_3] : memref<1x4x16xf32, #tpu.memory_space<vmem>>, vector<1x4x16xf32>
    %6 = vector.shape_cast %5 : vector<1x4x16xf32> to vector<4x16xf32>
    %c0_4 = arith.constant 0 : index
    %c0_5 = arith.constant 0 : index
    %7 = vector.load %arg3[%c0_4, %c0_5] : memref<4x1xf32, #tpu.memory_space<vmem>>, vector<4x1xf32>
    %cst = arith.constant dense<0.000000e+00> : vector<4xf32>
    %8 = vector.multi_reduction <add>, %6, %cst [1] : vector<4x16xf32> to vector<4xf32>
    %9 = vector.shape_cast %8 : vector<4xf32> to vector<4x1xf32>
    %10 = arith.addf %7, %9 : vector<4x1xf32>
    %c0_6 = arith.constant 0 : index
    %c0_7 = arith.constant 0 : index
    %11 = vector.load %arg3[%c0_6, %c0_7] : memref<4x1xf32, #tpu.memory_space<vmem>>, vector<4x1xf32>
    tpu.vector_store %arg3[%c0_6, %c0_7], %10 {strides = array<i32>} : memref<4x1xf32, #tpu.memory_space<vmem>>, vector<4x1xf32>,
    %c0_8 = arith.constant 0 : index
    %c0_9 = arith.constant 0 : index
    %12 = vector.load %arg4[%c0_8, %c0_9] : memref<4x1xf32, #tpu.memory_space<vmem>>, vector<4x1xf32>
    %13 = arith.mulf %6, %6 : vector<4x16xf32>
    %cst_10 = arith.constant dense<0.000000e+00> : vector<4xf32>
    %14 = vector.multi_reduction <add>, %13, %cst_10 [1] : vector<4x16xf32> to vector<4xf32>
    %15 = vector.shape_cast %14 : vector<4xf32> to vector<4x1xf32>
    %16 = arith.addf %12, %15 : vector<4x1xf32>
    %c0_11 = arith.constant 0 : index
    %c0_12 = arith.constant 0 : index
    %17 = vector.load %arg4[%c0_11, %c0_12] : memref<4x1xf32, #tpu.memory_space<vmem>>, vector<4x1xf32>
    tpu.vector_store %arg4[%c0_11, %c0_12], %16 {strides = array<i32>} : memref<4x1xf32, #tpu.memory_space<vmem>>, vector<4x1xf32>,
    return
  }
  func.func @transform_0(%arg0: i32, %arg1: i32) -> (i32, i32, i32) {
    %c0_i32 = arith.constant 0 : i32
    %c0_i32_0 = arith.constant 0 : i32
    return %arg0, %c0_i32, %arg1 : i32, i32, i32
  }
  func.func @transform_1(%arg0: i32, %arg1: i32) -> (i32, i32) {
    %c0_i32 = arith.constant 0 : i32
    %c0_i32_0 = arith.constant 0 : i32
    %c0_i32_1 = arith.constant 0 : i32
    return %c0_i32, %c0_i32_0 : i32, i32
  }
  func.func @transform_2(%arg0: i32, %arg1: i32) -> (i32, i32) {
    %c0_i32 = arith.constant 0 : i32
    %c0_i32_0 = arith.constant 0 : i32
    %c0_i32_1 = arith.constant 0 : i32
    return %c0_i32, %c0_i32_0 : i32, i32
  }
}

</mosaic_0001>

<bundles_post_ra>
// kernel: tpu_custom_call.1
= control target key start
LH: loop header
LB: loop body
LE: loop exit
PB: predicated region body
PF: predicated region fallthrough
CT: control target
= control target key end

     0   :  { %8 = vsyncpa [#allocation3], 0  ;;  %s517_s0 = inlined_call_operand.hbm [shape: f32[2,4,16], index: 0, kind: input, shape index: {}]   ;;  %s518_s1 = inlined_call_operand.vmem [shape: f32[4,1], index: 1, kind: output, shape index: {0}]   ;;  %s519_s2 = inlined_call_operand.vmem [shape: f32[4,1], index: 2, kind: output, shape index: {1}]  }
   0x1   :  { %10 = vsyncpa [#allocation3 + $0x1], 0  ;;  %s403_s9 = smov 0   ;;  %s405_s10 = smov 0  }
   0x2   :  { %s407_s11 = smov 0   ;;  %s409_s12 = smov 0  }
   0x3   :  { %s411_s13 = smov 0   ;;  %s413_s14 = smov 0  }
   0x4 LB: > { %s239_s15 = sadd.s32 4294967295, %s384_s14   ;;  %s28_s16 = sadd.s32 1, %s380_s13  ;;  %s384_s14 = sphi %s413_s14, %s16_s14   ;;  %s380_s13 = sphi %s411_s13, %s527_s13   ;;  %s376_s12 = sphi %s409_s12, %s526_s12   ;;  %s372_s11 = sphi %s407_s11, %s525_s11   ;;  %s368_s10 = sphi %s405_s10, %s524_s10   ;;  %s364_s9 = sphi %s403_s9, %s523_s9  }
   0x5   : > { %p30_p0 = scmp.ge.s32.totalorder %s28_s16, 2  ;;  %s37_s17 = sadd.s32 1, %s372_s11 }
   0x6   : > { %p44_p1 = scmp.ne.s32.totalorder %s372_s11, %s368_s10  ;;  %p45_p2 = scmp.eq.s32.totalorder %s384_s14, 0 }
   0x7   : > { %s529_s16 = smov (%p30_p0, %s28_s16), 0  ;;  %p50_p4 = scmp.ne.s32.totalorder %s368_s10, %s364_s9 }
   0x8   : > { %p439_p3 = por %p45_p2, %p44_p1  ;;  %s32_s19 = ssub.s32 %s380_s13, %s529_s16 }
   0x9   : > { %p51_p5 = scmp.eq.s32.totalorder %s239_s15, 0  ;;  %p35_p6 = scmp.eq.s32.totalorder %s32_s19, 0 }
   0xa   : > { %p256_p8 = scmp.lt.s32.totalorder %s384_s14, 2  ;;  %s116_s22 = sand.u32 1, %s372_s11  }
   0xb   : > { %p446_p7 = por %p51_p5, %p50_p4  ;;  %s243_s23 = sshll.u32 %s380_s13, 6 }
   0xc   : > { %s452_s21 = scalar_select %p35_p6, %s372_s11, %s37_s17  }
   0xd   : > { %s242_s24 = sshll.u32 %s116_s22, 2  ;;  %s126_s27 = scalar_lea.hbm %s517_s0, %s243_s23 }
   0xe   : > { %s120_s28 = scalar_lea.vmem [#allocation2], %s242_s24  ;;  %p461_p9 = pnand %p256_p8, %p439_p3 }
   0xf   : > { %s128_s29 = sshll.u32 %s120_s28, 4  ;;  %p244_p10 = scmp.ge.s32.totalorder %s384_s14, 1  ;;  %s129_s29 = int_to_ptr.vmem [resolvable:$true] %s128_s29 }
  0x10   : > { %p133_p11 = scmp.lt.s32.totalorder %s384_s14, 3  ;;  %s117_s3 = scalar_lea.sflag [#allocation3], %s116_s22 }
  0x11   : > { %p308_p12 = pneg %p461_p9  ;;  %s319_s4 = scalar_lea.vmem %s129_s29, 64 }
  0x12   : > { %p320_p13 = scmp.ne.s32.totalorder %s129_s29, %s319_s4  ;;  %s386_s5 = smov [#allocation2]  }
  0x13   : > { %s324_s6 = sshll.u32 %s386_s5, 4  ;;  %s325_s6 = int_to_ptr.vmem [resolvable:$false] %s324_s6 }
  0x14   : > { %p322_p0 = pnand %p320_p13, %p308_p12  ;;  %s326_s7 = scalar_lea.vmem %s325_s6, 128 }
  0x15   : > { %p327_p2 = scmp.lt.s32.totalorder %s129_s29, %s325_s6  ;;  %p328_p3 = scmp.lt.s32.totalorder %s326_s7, %s319_s4 }
  0x16   : > { %p323_p1 = pneg %p322_p0 }
  0x17   : > { %p329_p4 = por %p328_p3, %p327_p2 }
  0x19   : > { %p330_p5 = pnand %p329_p4, %p323_p1 }
  0x1b   : > { %333 = shalt.err (!%p330_p5)
}
  0x1c   : > { %255 = dma.hbm_to_vmem [thread:$0]  (!%p461_p9), %s126_s27, 64, %s129_s29, %s117_s3  }
  0x1d   : > { %p134_p6 = pnand %p244_p10, %p133_p11 }
  0x1e   : > { %s139_s8 = sand.u32 (!%p134_p6), 1, %s368_s10  }
  0x1f   : > { %137 = sbr.rel (%p134_p6) target bundleno = 191 (0xbf), region = 24  ;;  %s245_s9 = sshll.u32 (!%p134_p6), %s139_s8, 2 }
  0x20   : > { %s140_s15 = scalar_lea.sflag (!%p134_p6), [#allocation3], %s139_s8  ;;  %s143_s17 = scalar_lea.vmem (!%p134_p6), [#allocation2], %s245_s9 }
  0x24   : > { %359 = dma.done.wait (%p446_p7), %s140_s15, 64  }
  0x25   : > { %361 = vsyncadd (%p446_p7), %s140_s15, 4294967232  ;;  %p159_p8 = scmp.eq.s32.totalorder %s376_s12, 0 }
  0x26   : > { %vm165_vm0 = vcmask (%p159_p8), 3072   ;;  %v387_v0 = vmov (%p159_p8), 0.0  }
  0x27   : > { %164 = sbr.rel (!%p159_p8) target bundleno = 44 (0x2c), region = 32  ;;  %166 = vst.msk [vmem:[%s518_s1] sm:$0xf] (%p159_p8), %vm165_vm0, %v387_v0  ;;  %167 = vst.msk [vmem:[%s519_s2] sm:$0xf] (%p159_p8), %vm165_vm0, %v387_v0 }
  0x2c PF: > { %v168_v1 = vld [vmem:[%s143_s17] sm:$0xf]  ;;  %vm170_vm1 = vcmask 125952   ;;  %vm175_vm2 = vcmask 3072  }
  0x2d   : > { %v171_v2 = vsel %vm170_vm1, %v168_v1, 0.0  ;;  %v178_v3 = vmul.f32 %v168_v1, %v168_v1 }
  0x2e   : > { %172 = vadd.xlane.f32.xlu0 %v171_v2  ;;  %v169_v5 = vld [vmem:[%s518_s1] sm:$0xf] }
  0x2f   : > { %v179_v4 = vsel %vm170_vm1, %v178_v3, 0.0  ;;  %v177_v8 = vld [vmem:[%s519_s2] sm:$0xf] }
  0x32   : > { %180 = vadd.xlane.f32.xlu0 %v179_v4 }
  0xb7   : > { %v173_v6 = vpop.xlane.xlu0 %172 }
  0xb8   : > { %v174_v7 = vadd.f32 %v173_v6, %v169_v5 }
  0xba   : > { %176 = vst.msk [vmem:[%s518_s1] sm:$0xf] %vm175_vm2, %v174_v7 }
  0xbb   : > { %v181_v9 = vpop.xlane.xlu0 %180 }
  0xbc   : > { %v182_v10 = vadd.f32 %v181_v9, %v177_v8 }
  0xbe   : > { %183 = vst.msk [vmem:[%s519_s2] sm:$0xf] %vm175_vm2, %v182_v10 }
  0xbf PF: > { %s16_s14 = sadd.s32 1, %s384_s14   ;;  %s523_s9 = smov %s368_s10 }
  0xc0   : > { %p13_p7 = scmp.ge.s32.totalorder %s16_s14, 4   ;;  %s524_s10 = smov %s372_s11 }
  0xc1   : > { %s525_s11 = smov %s452_s21  ;;  %s526_s12 = smov %s380_s13 }
  0xc2   : > { %s527_s13 = smov %s529_s16  ;;  %15 = sbr.rel (!%p13_p7) target bundleno = 4 (0x4), region = 72 }
  0xc7   :  { %201 = vsyncpa [#allocation3], 1 }
  0xc8   :  { %203 = vsyncpa [#allocation3 + $0x1], 1 }

</bundles_post_ra>
